<compile_context>
chip_gen: v7x
topology: tpu7x:2x2x1
jax: 0.10.0
libtpu: 0.0.40
codegen_flags: <defaults>
</compile_context>

<pallas_src>
import jax
import jax.numpy as jnp
from jax import lax
from jax.experimental import pallas as pl
from jax.experimental.pallas import tpu as pltpu

SOFTMAX_SCALE = 0.125

# The approximate (EUP) reciprocal is essentially free but introduces ~1e-4
# relative error; kept exact here to preserve 1e-5 parity with F.softmax.
# Flip to True in production if that tolerance is acceptable.
APPROX_RECIPROCAL = False


def _attn_kernel(q_ref, k_ref, v_ref, o_ref):
    q = q_ref[...]  # (TB, TQ, D), input dtype (MXU operand)
    k = k_ref[...]  # (TB, S,  D)
    v = v_ref[...]  # (TB, S,  D)

    # Fold the softmax scale into q: 0.125 is a power of two, so this is
    # bit-identical to scaling the scores, with far fewer multiplies.
    qs = q * SOFTMAX_SCALE

    # scores = q @ k^T, expressed as a contraction over the feature dim so
    # no transpose/relayout of k is materialized before the MXU push.
    s = lax.dot_general(
        qs, k,
        dimension_numbers=(((2,), (2,)), ((0,), (0,))),
        preferred_element_type=jnp.float32,
    )  # (TB, TQ, S) f32

    # Numerically-stable softmax statistics (f32).
    m = jnp.max(s, axis=-1, keepdims=True)
    p = jnp.exp(s - m)                              # (TB, TQ, S) f32
    denom = jnp.sum(p, axis=-1, keepdims=True)      # (TB, TQ, 1)  f32

    # Un-normalized output; probabilities cast to the MXU operand dtype
    # (no-op for f32 inputs, bf16 path for bf16 inputs).
    o = lax.dot_general(
        p.astype(v.dtype), v,
        dimension_numbers=(((2,), (1,)), ((0,), (0,))),
        preferred_element_type=jnp.float32,
    )  # (TB, TQ, D) f32

    # Deferred normalization: one reciprocal + (TQ, D) multiplies instead of
    # normalizing the full (TQ, S) probability matrix.
    inv = pl.reciprocal(denom, approx=APPROX_RECIPROCAL)
    o_ref[...] = (o * inv).astype(o_ref.dtype)


def _pick_query_tile(S):
    for t in (512, 256, 128):
        if t <= S and S % t == 0:
            return t
    return S


def _pick_heads_per_block(BH, S, tq, D, itemsize):
    # Keep per-step live bytes well under the VMEM limit:
    #   f32 score tile + double-buffered k/v (resident across q tiles) +
    #   double-buffered q/o blocks.
    budget = 24 * 1024 * 1024
    n_qtiles = S // tq
    per_head = tq * S * 4 + 2 * 2 * S * D * itemsize + 2 * 2 * tq * D * itemsize
    for cand in (8, 4, 2):
        if (BH % cand == 0
                and cand * per_head <= budget
                and (BH // cand) * n_qtiles >= 2):   # keep >=2 grid points for 2 TCs
            return cand
    return 1


def attn_pallas(q, k, v, *, tq=None, heads_per_block=None,
                vmem_limit_bytes=48 * 1024 * 1024):
    """q, k, v: (B, H, S, D) arrays. Returns (B, H, S, D)."""
    B, H, S, D = q.shape
    BH = B * H
    qf = q.reshape(BH, S, D)
    kf = k.reshape(BH, S, D)
    vf = v.reshape(BH, S, D)

    if tq is None:
        tq = _pick_query_tile(S)
    assert S % tq == 0, "query tile must divide S"

    if heads_per_block is None:
        heads_per_block = _pick_heads_per_block(
            BH, S, tq, D, jnp.dtype(q.dtype).itemsize)
    tb = heads_per_block
    assert BH % tb == 0, "heads_per_block must divide B*H"

    # Head-block axis outer, query-tile axis innermost so the k/v blocks
    # (whose index_map ignores the q-tile index) are reused without re-DMA.
    grid = (BH // tb, S // tq)

    # TODO(synk): for S large enough that a full (S, D) k/v block no longer
    # fits VMEM, add a KV grid axis with an online-softmax (flash) accumulator.
    out = pl.pallas_call(
        _attn_kernel,
        out_shape=jax.ShapeDtypeStruct((BH, S, D), q.dtype),
        grid_spec=pltpu.PrefetchScalarGridSpec(
            num_scalar_prefetch=0,
            grid=grid,
            in_specs=[
                pl.BlockSpec((tb, tq, D), lambda h, qi: (h, qi, 0)),  # q
                pl.BlockSpec((tb, S, D), lambda h, qi: (h, 0, 0)),    # k (resident)
                pl.BlockSpec((tb, S, D), lambda h, qi: (h, 0, 0)),    # v (resident)
            ],
            out_specs=pl.BlockSpec((tb, tq, D), lambda h, qi: (h, qi, 0)),
        ),
        compiler_params=pltpu.CompilerParams(
            dimension_semantics=("parallel", "parallel"),
            vmem_limit_bytes=vmem_limit_bytes,
        ),
    )(qf, kf, vf)
    return out.reshape(B, H, S, D)


def _reference(q, k, v):
    s = jnp.einsum("bhqd,bhkd->bhqk", q, k) * SOFTMAX_SCALE
    attn = jax.nn.softmax(s, axis=-1)
    return jnp.einsum("bhqk,bhkd->bhqd", attn, v)


if __name__ == "__main__":
    B, H, S, D = 2, 4, 8, 32
    key = jax.random.PRNGKey(0)
    kq, kk, kv = jax.random.split(key, 3)
    q = jax.random.normal(kq, (B, H, S, D), dtype=jnp.float32)
    k = jax.random.normal(kk, (B, H, S, D), dtype=jnp.float32)
    v = jax.random.normal(kv, (B, H, S, D), dtype=jnp.float32)

    out = attn_pallas(q, k, v)
    jax.block_until_ready(out)

    ref = _reference(q, k, v)
    assert out.shape == (B, H, S, D)
    assert jnp.allclose(out, ref, atol=1e-5, rtol=1e-5), "mismatch vs reference"

    print("KERNEL_OK")
</pallas_src>

<mosaic_0001>
module attributes {stable_mosaic.version = 11 : i64} {
  func.func @_attn_kernel(%arg0: i32, %arg1: i32, %arg2: memref<4x8x32xf32, #tpu.memory_space<vmem>>, %arg3: memref<4x8x32xf32, #tpu.memory_space<vmem>>, %arg4: memref<4x8x32xf32, #tpu.memory_space<vmem>>, %arg5: memref<4x8x32xf32, #tpu.memory_space<vmem>>) attributes {dimension_semantics = [#tpu.dimension_semantics<parallel>, #tpu.dimension_semantics<parallel>], iteration_bounds = array<i64: 2, 1>, scalar_prefetch = 0 : i64, scratch_operands = 0 : i64, tpu.core_type = #tpu.core_type<tc>, window_params = [{transform_indices = @transform_0, window_bounds = array<i64: 4, 8, 32>}, {transform_indices = @transform_1, window_bounds = array<i64: 4, 8, 32>}, {transform_indices = @transform_2, window_bounds = array<i64: 4, 8, 32>}, {transform_indices = @transform_3, window_bounds = array<i64: 4, 8, 32>}]} {
    %c0 = arith.constant 0 : index
    %c0_0 = arith.constant 0 : index
    %c0_1 = arith.constant 0 : index
    %0 = vector.load %arg2[%c0, %c0_0, %c0_1] : memref<4x8x32xf32, #tpu.memory_space<vmem>>, vector<4x8x32xf32>
    %c0_2 = arith.constant 0 : index
    %c0_3 = arith.constant 0 : index
    %c0_4 = arith.constant 0 : index
    %1 = vector.load %arg3[%c0_2, %c0_3, %c0_4] : memref<4x8x32xf32, #tpu.memory_space<vmem>>, vector<4x8x32xf32>
    %c0_5 = arith.constant 0 : index
    %c0_6 = arith.constant 0 : index
    %c0_7 = arith.constant 0 : index
    %2 = vector.load %arg4[%c0_5, %c0_6, %c0_7] : memref<4x8x32xf32, #tpu.memory_space<vmem>>, vector<4x8x32xf32>
    %cst = arith.constant 1.250000e-01 : f32
    %3 = vector.broadcast %cst : f32 to vector<4x8x32xf32>
    %4 = arith.mulf %0, %3 : vector<4x8x32xf32>
    %cst_8 = arith.constant dense<0.000000e+00> : vector<4x8x8xf32>
    %5 = tpu.matmul %4, %1, %cst_8 {dimension_numbers = #tpu.dot_dimension_numbers<[2], [2], [1], [1], [0, 0, 0, 1, 1, 1], [0], [0]>} : vector<4x8x32xf32>, vector<4x8x32xf32>, vector<4x8x8xf32> -> vector<4x8x8xf32>
    %cst_9 = arith.constant dense<0xFF800000> : vector<4x8xf32>
    %6 = vector.multi_reduction <maximumf>, %5, %cst_9 [2] : vector<4x8x8xf32> to vector<4x8xf32>
    %7 = vector.shape_cast %6 : vector<4x8xf32> to vector<4x8x1xf32>
    %8 = vector.broadcast %7 : vector<4x8x1xf32> to vector<4x8x8xf32>
    %9 = arith.subf %5, %8 : vector<4x8x8xf32>
    %10 = math.exp %9 : vector<4x8x8xf32>
    %cst_10 = arith.constant dense<0.000000e+00> : vector<4x8xf32>
    %11 = vector.multi_reduction <add>, %10, %cst_10 [2] : vector<4x8x8xf32> to vector<4x8xf32>
    %12 = vector.shape_cast %11 : vector<4x8xf32> to vector<4x8x1xf32>
    %cst_11 = arith.constant dense<0.000000e+00> : vector<4x8x32xf32>
    %13 = tpu.matmul %10, %2, %cst_11 {dimension_numbers = #tpu.dot_dimension_numbers<[2], [1], [1], [2], [0, 0, 0, 1, 1, 2], [0], [0]>} : vector<4x8x8xf32>, vector<4x8x32xf32>, vector<4x8x32xf32> -> vector<4x8x32xf32>
    %14 = tpu.reciprocal %12 : vector<4x8x1xf32> -> vector<4x8x1xf32>
    %15 = vector.broadcast %14 : vector<4x8x1xf32> to vector<4x8x32xf32>
    %16 = arith.mulf %13, %15 : vector<4x8x32xf32>
    %c0_12 = arith.constant 0 : index
    %c0_13 = arith.constant 0 : index
    %c0_14 = arith.constant 0 : index
    %17 = vector.load %arg5[%c0_12, %c0_13, %c0_14] : memref<4x8x32xf32, #tpu.memory_space<vmem>>, vector<4x8x32xf32>
    tpu.vector_store %arg5[%c0_12, %c0_13, %c0_14], %16 {strides = array<i32>} : memref<4x8x32xf32, #tpu.memory_space<vmem>>, vector<4x8x32xf32>,
    return
  }
  func.func @transform_0(%arg0: i32, %arg1: i32) -> (i32, i32, i32) {
    %c0_i32 = arith.constant 0 : i32
    %c0_i32_0 = arith.constant 0 : i32
    return %arg0, %arg1, %c0_i32 : i32, i32, i32
  }
  func.func @transform_1(%arg0: i32, %arg1: i32) -> (i32, i32, i32) {
    %c0_i32 = arith.constant 0 : i32
    %c0_i32_0 = arith.constant 0 : i32
    %c0_i32_1 = arith.constant 0 : i32
    return %arg0, %c0_i32, %c0_i32_0 : i32, i32, i32
  }
  func.func @transform_2(%arg0: i32, %arg1: i32) -> (i32, i32, i32) {
    %c0_i32 = arith.constant 0 : i32
    %c0_i32_0 = arith.constant 0 : i32
    %c0_i32_1 = arith.constant 0 : i32
    return %arg0, %c0_i32, %c0_i32_0 : i32, i32, i32
  }
  func.func @transform_3(%arg0: i32, %arg1: i32) -> (i32, i32, i32) {
    %c0_i32 = arith.constant 0 : i32
    %c0_i32_0 = arith.constant 0 : i32
    return %arg0, %arg1, %c0_i32 : i32, i32, i32
  }
}

</mosaic_0001>

<bundles_post_ra>
// kernel: tpu_custom_call.1
= control target key start
LH: loop header
LB: loop body
LE: loop exit
PB: predicated region body
PF: predicated region fallthrough
CT: control target
= control target key end

     0   :  { %s1821_s0 = inlined_call_operand.hbm [shape: f32[8,8,32], index: 0, kind: input, shape index: {}]   ;;  %s1822_s1 = inlined_call_operand.hbm [shape: f32[8,8,32], index: 1, kind: input, shape index: {}]   ;;  %s1823_s2 = inlined_call_operand.hbm [shape: f32[8,8,32], index: 2, kind: input, shape index: {}]   ;;  %s1824_s3 = inlined_call_operand.hbm [shape: f32[8,8,32], index: 3, kind: output, shape index: {}]  }
   0x1   :  { %1834 = sst [smem:[#allocation15_spill]] %s1822_s1 }
   0x2   :  { %8 = vsyncpa [#allocation3], 0 }
   0x3   :  { %10 = vsyncpa [#allocation3 + $0x1], 0 }
   0x4   :  { %11 = vsyncpa [#allocation6], 0 }
   0x5   :  { %13 = vsyncpa [#allocation6 + $0x1], 0 }
   0x6   :  { %14 = vsyncpa [#allocation4], 0 }
   0x7   :  { %16 = vsyncpa [#allocation4 + $0x1], 0  ;;  %s1489_s12 = smov 0   ;;  %s1491_s13 = smov 0  }
   0x8   :  { %s1493_s14 = smov 0   ;;  %s1495_s15 = smov 0  }
   0x9   :  { %s1497_s16 = smov 0   ;;  %s1499_s17 = smov 0  }
   0xa LB: > { %1835 = sst [smem:[#allocation12_spill]] %s1453_s16  ;;  %s1520_s18 = sadd.s32 4294967295, %s1457_s17   ;;  %s1457_s17 = sphi %s1499_s17, %s22_s17   ;;  %s1453_s16 = sphi %s1497_s16, %s1858_s16   ;;  %s1449_s15 = sphi %s1495_s15, %s1857_s15   ;;  %s1445_s14 = sphi %s1493_s14, %s1861_s14   ;;  %s1441_s13 = sphi %s1491_s13, %s1860_s13   ;;  %s1437_s12 = sphi %s1489_s12, %s1859_s12  }
   0xb   : > { %s1093_s19 = sadd.s32 4294967294, %s1457_s17   ;;  %s34_s20 = sadd.s32 1, %s1453_s16 }
   0xc   : > { %s43_s21 = sadd.s32 1, %s1445_s14  ;;  %p36_p0 = scmp.ge.s32.totalorder %s34_s20, 2 }
   0xd   : > { %p50_p1 = scmp.ne.s32.totalorder %s1445_s14, %s1441_s13  ;;  %p51_p2 = scmp.eq.s32.totalorder %s1457_s17, 0 }
   0xe   : > { %p56_p3 = scmp.ne.s32.totalorder %s1441_s13, %s1437_s12  ;;  %s1863_s20 = smov (%p36_p0, %s34_s20), 0 }
   0xf   : > { %1836 = sst [smem:[#allocation13_spill]] %s1863_s20  ;;  %p1532_p4 = por %p51_p2, %p50_p1 }
  0x10   : > { %p57_p5 = scmp.eq.s32.totalorder %s1520_s18, 0  ;;  %s38_s23 = ssub.s32 %s1453_s16, %s1863_s20 }
  0x11   : > { %p134_p6 = scmp.eq.s32.totalorder %s1520_s18, 1  ;;  %p41_p7 = scmp.eq.s32.totalorder %s38_s23, 0 }
  0x12   : > { %p1540_p8 = por %p57_p5, %p56_p3  ;;  %p140_p10 = scmp.eq.s32.totalorder %s1093_s19, 1 }
  0x13   : > { %p1544_p9 = por %p134_p6, %p50_p1  ;;  %p1209_p13 = scmp.lt.s32.totalorder %s1457_s17, 2 }
  0x14   : > { %s1838_s24 = scalar_select %p1540_p8, 1, 0 }
  0x15   : > { %s1839_s25 = scalar_select %p1544_p9, 1, 0 }
  0x16   : > { %s1549_s26 = scalar_select %p41_p7, %s1445_s14, %s43_s21  }
  0x17   : > { %p1551_p11 = por %p140_p10, %p56_p3  ;;  %s1827_s28 = sand.u32 1, %s1445_s14  }
  0x18   : > { %1840 = sst [smem:[#allocation14_spill]] %s1549_s26  ;;  %s1560_s29 = sshll.u32 %s1827_s28, 5 }
  0x19   : > { %s1841_s27 = scalar_select %p1551_p11, 1, 0 }
  0x1a   : > { %s1563_s30 = sshll.u32 %s1453_s16, 9  ;;  %p1567_p0 = pnand %p1209_p13, %p1532_p4 }
  0x1b   : > { %s182_s5 = sand.u32 1, %s1457_s17   ;;  %s1843_s1 = sld [smem:[#allocation15_spill]] }
  0x1c   : > { %s186_s9 = scalar_lea.vmem [#allocation5], %s1560_s29  ;;  %s1583_s11 = scalar_lea.sflag [#allocation6], %s182_s5 }
  0x1d   : > { %s193_s10 = sshll.u32 %s186_s9, 4  ;;  %p1589_p4 = pneg %p1567_p0  ;;  %s1580_s10 = int_to_ptr.vmem [resolvable:$true] %s193_s10 }
  0x21   : > { %s1576_s8 = scalar_lea.hbm %s1843_s1, %s1563_s30  ;;  %s1286_s6 = scalar_lea.hbm %s1843_s1, 1024 }
  0x22   : > { %s1281_s19 = scalar_lea.hbm %s1576_s8, 512  ;;  %p1287_p7 = scmp.lt.u32.totalorder %s1576_s8, %s1843_s1 }
  0x23   : > { %p1282_p3 = scmp.ne.s32.totalorder %s1576_s8, %s1281_s19  ;;  %p1288_p10 = scmp.lt.u32.totalorder %s1286_s6, %s1281_s19 }
  0x24   : > { %p1290_p12 = scmp.lt.u32.totalorder %s1281_s19, %s1576_s8 }
  0x25   : > { %p1284_p5 = pnand %p1589_p4, %p1282_p3  ;;  %p1289_p13 = por %p1288_p10, %p1287_p7 }
  0x27   : > { %p1285_p6 = pneg %p1284_p5  ;;  %p1291_p1 = por %p1290_p12, %p1289_p13 }
  0x29   : > { %p1292_p2 = pnand %p1291_p1, %p1285_p6 }
  0x2b   : > { %1295 = shalt.err (!%p1292_p2)
}
  0x2c   : > { %s1296_s5 = scalar_lea.vmem %s1580_s10, 512  ;;  %s1459_s22 = smov [#allocation5]  }
  0x2d   : > { %p1297_p3 = scmp.ne.s32.totalorder %s1580_s10, %s1296_s5  ;;  %s1301_s23 = sshll.u32 %s1459_s22, 4  ;;  %s1302_s23 = int_to_ptr.vmem [resolvable:$false] %s1301_s23 }
  0x2e   : > { %s1303_s7 = scalar_lea.vmem %s1302_s23, 1024  ;;  %p1304_p9 = scmp.lt.s32.totalorder %s1580_s10, %s1302_s23 }
  0x2f   : > { %p1299_p5 = pnand %p1297_p3, %p1589_p4  ;;  %p1305_p8 = scmp.lt.s32.totalorder %s1303_s7, %s1296_s5 }
  0x31   : > { %p1300_p11 = pneg %p1299_p5  ;;  %p1306_p7 = por %p1305_p8, %p1304_p9 }
  0x33   : > { %p1307_p10 = pnand %p1306_p7, %p1300_p11 }
  0x35   : > { %1310 = shalt.err (!%p1307_p10)
}
  0x36   : > { %s1828_s19 = smov 128   ;;  %s1830_s6 = smov 8  }
  0x37   : > { %1201 = dma.hbm_to_vmem [thread:$0]  (!%p1567_p0), %s1576_s8, 512, %s1580_s10, %s1583_s11, %s1828_s19, %s1828_s19, %s1830_s6  }
  0x38   : > { %p1845_p8 = scmp.lt.s32.totalorder %s1457_s17, 3  ;;  %p1846_p9 = scmp.ge.s32.totalorder %s1457_s17, 1 }
  0x39   : > { %s1628_s23 = scalar_lea.hbm %s1821_s0, %s1563_s30  ;;  %s164_s7 = scalar_lea.vmem [#allocation2], %s1560_s29 }
  0x3a   : > { %p1620_p11 = pnand %p1846_p9, %p1845_p8  ;;  %s172_s28 = sshll.u32 %s164_s7, 4  ;;  %s1631_s28 = int_to_ptr.vmem [resolvable:$true] %s172_s28 }
  0x3b   : > { %s1637_s19 = scalar_lea.hbm %s1823_s2, %s1563_s30  ;;  %s1848_s6 = sand.u32 1, %s1445_s14  }
  0x3c   : > { %s1847_s9 = scalar_select %p1620_p11, 1, 0 }
  0x3d   : > { %s1641_s1 = scalar_lea.sflag [#allocation3], %s1848_s6  ;;  %s1311_s20 = scalar_lea.hbm %s1628_s23, 512 }
  0x3e   : > { %p1312_p12 = scmp.ne.s32.totalorder %s1628_s23, %s1311_s20  ;;  %s1316_s16 = scalar_lea.hbm %s1821_s0, 1024 }
  0x3f   : > { %p1317_p6 = scmp.lt.u32.totalorder %s1628_s23, %s1821_s0  ;;  %p1318_p13 = scmp.lt.u32.totalorder %s1316_s16, %s1311_s20 }
  0x40   : > { %p1314_p1 = pnand %p1312_p12, %p1589_p4  ;;  %p1320_p5 = scmp.lt.u32.totalorder %s1311_s20, %s1628_s23 }
  0x41   : > { %p1319_p3 = por %p1318_p13, %p1317_p6 }
  0x42   : > { %p1315_p2 = pneg %p1314_p1 }
  0x43   : > { %p1321_p7 = por %p1320_p5, %p1319_p3 }
  0x45   : > { %p1322_p10 = pnand %p1321_p7, %p1315_p2 }
  0x47   : > { %1325 = shalt.err (!%p1322_p10)
}
  0x48   : > { %s1326_s30 = scalar_lea.vmem %s1631_s28, 512  ;;  %s1462_s6 = smov [#allocation2]  }
  0x49   : > { %p1327_p8 = scmp.ne.s32.totalorder %s1631_s28, %s1326_s30  ;;  %s1331_s8 = sshll.u32 %s1462_s6, 4  ;;  %s1332_s8 = int_to_ptr.vmem [resolvable:$false] %s1331_s8 }
  0x4a   : > { %s1333_s26 = scalar_lea.vmem %s1332_s8, 1024  ;;  %p1334_p1 = scmp.lt.s32.totalorder %s1631_s28, %s1332_s8 }
  0x4b   : > { %p1329_p9 = pnand %p1327_p8, %p1589_p4  ;;  %p1335_p11 = scmp.lt.s32.totalorder %s1333_s26, %s1326_s30 }
  0x4d   : > { %p1330_p12 = pneg %p1329_p9  ;;  %p1336_p6 = por %p1335_p11, %p1334_p1 }
  0x4f   : > { %p1337_p13 = pnand %p1336_p6, %p1330_p12 }
  0x51   : > { %1340 = shalt.err (!%p1337_p13)
}
  0x52   : > { %s1849_s16 = smov 8   ;;  %s1850_s20 = smov 128  }
  0x53   : > { %1198 = dma.hbm_to_vmem [thread:$0]  (!%p1567_p0), %s1628_s23, 512, %s1631_s28, %s1641_s1, %s1850_s20, %s1850_s20, %s1849_s16  }
  0x54   : > { %s207_s10 = scalar_lea.vmem [#allocation7], %s1560_s29  ;;  %s1341_s22 = scalar_lea.hbm %s1637_s19, 512 }
  0x55   : > { %s214_s5 = sshll.u32 %s207_s10, 4  ;;  %p1342_p11 = scmp.ne.s32.totalorder %s1637_s19, %s1341_s22  ;;  %s1669_s5 = int_to_ptr.vmem [resolvable:$true] %s214_s5 }
  0x56   : > { %s1346_s6 = scalar_lea.hbm %s1823_s2, 1024  ;;  %p1347_p5 = scmp.lt.u32.totalorder %s1637_s19, %s1823_s2 }
  0x57   : > { %p1344_p2 = pnand %p1342_p11, %p1589_p4  ;;  %p1348_p7 = scmp.lt.u32.totalorder %s1346_s6, %s1341_s22 }
  0x58   : > { %p1350_p8 = scmp.lt.u32.totalorder %s1341_s22, %s1637_s19 }
  0x59   : > { %p1345_p3 = pneg %p1344_p2  ;;  %p1349_p10 = por %p1348_p7, %p1347_p5 }
  0x5b   : > { %p1351_p9 = por %p1350_p8, %p1349_p10 }
  0x5d   : > { %p1352_p12 = pnand %p1351_p9, %p1345_p3 }
  0x5f   : > { %1355 = shalt.err (!%p1352_p12)
}
  0x60   : > { %s1356_s1 = scalar_lea.vmem %s1669_s5, 512  ;;  %s1463_s28 = smov [#allocation7]  }
  0x61   : > { %p1357_p1 = scmp.ne.s32.totalorder %s1669_s5, %s1356_s1  ;;  %s1361_s29 = sshll.u32 %s1463_s28, 4  ;;  %s1362_s29 = int_to_ptr.vmem [resolvable:$false] %s1361_s29 }
  0x62   : > { %s1363_s23 = scalar_lea.vmem %s1362_s29, 1024  ;;  %p1364_p11 = scmp.lt.s32.totalorder %s1669_s5, %s1362_s29 }
  0x63   : > { %p1359_p6 = pnand %p1357_p1, %p1589_p4  ;;  %p1365_p2 = scmp.lt.s32.totalorder %s1363_s23, %s1356_s1 }
  0x65   : > { %p1360_p13 = pneg %p1359_p6  ;;  %p1366_p5 = por %p1365_p2, %p1364_p11 }
  0x67   : > { %p1367_p7 = pnand %p1366_p5, %p1360_p13 }
  0x69   : > { %1370 = shalt.err (!%p1367_p7)
}
  0x6a   : > { %1204 = dma.hbm_to_vmem [thread:$0]  (!%p1567_p0), %s1637_s19, 512, %s1669_s5, %s1583_s11, %s1850_s20, %s1850_s20, %s1849_s16  }
  0x6b   : > { %p1851_p4 = scmp.ne.s32.totalorder %s1847_s9, 0 }
  0x6c   : > { %s1699_s21 = sand.u32 (!%p1851_p4), 1, %s1441_s13   ;;  %p1852_p3 = scmp.ne.s32.totalorder (!%p1851_p4), %s1838_s24, 0 }
  0x6d   : > { %226 = sbr.rel (%p1851_p4) target bundleno = 733 (0x2dd), region = 32  ;;  %s1702_s10 = sshll.u32 (!%p1851_p4), %s1699_s21, 5 }
  0x6e   : > { %s229_s4 = scalar_lea.sflag (!%p1851_p4), [#allocation3], %s1699_s21  ;;  %s232_s22 = scalar_lea.vmem (!%p1851_p4), [#allocation2], %s1702_s10 }
  0x74   : > { %1424 = dma.done.wait (%p1852_p3), %s229_s4, 512  }
  0x75   : > { %1426 = vsyncadd (%p1852_p3), %s229_s4, 4294966784  ;;  %s237_s11 = sand.u32 1, %s1520_s18   ;;  %s241_s9 = scalar_lea.vmem [#allocation5], %s1702_s10 }
  0x76   : > { %s238_s19 = scalar_lea.sflag [#allocation6], %s237_s11 }
  0x77   : > { %1428 = dma.done.wait (%p1852_p3), %s238_s19, 1024  }
  0x78   : > { %1430 = vsyncadd (%p1852_p3), %s238_s19, 4294966272  ;;  %v1464_v0 = vmov 0.0   ;;  %vm1465_vm0 = vmmov 0   ;;  %vm303_vm1 = vcmask 261120   ;;  %v291_v1 = vld [vmem:[%s241_s9] sm:$0xff]  ;;  %v292_v3 = vld [vmem:[%s241_s9 + $0x8] sm:$0xff] }
  0x79   : > { %1147 = vmatprep.subr.mxu0 %v1464_v0  ;;  %1149 = vmatprep.mubr.msk.f32.mxu0 %vm1465_vm0, %v1464_v0  ;;  %v287_v2 = vld [vmem:[%s232_s22] sm:$0xff]  ;;  %v288_v5 = vld [vmem:[%s232_s22 + $0x8] sm:$0xff]  ;;  %v289_v6 = vld [vmem:[%s232_s22 + $0x10] sm:$0xff]  ;;  %vm608_vm2 = vcmask 64512   ;;  %s250_s18 = scalar_lea.vmem [#allocation7], %s1702_s10  ;;  %s282_s24 = scalar_lea.vmem [#allocation8], %s1702_s10 }
  0x7a   : > { %1152 = vmatprep.subr.mxu1 %v1464_v0  ;;  %1154 = vmatprep.mubr.msk.f32.mxu1 %vm1465_vm0, %v1464_v0  ;;  %v299_v4 = vmul.f32 0.125, %v287_v2  ;;  %v293_v7 = vld [vmem:[%s241_s9 + $0x10] sm:$0xff]  ;;  %v300_v8 = vmul.f32 0.125, %v288_v5  ;;  %v290_v9 = vld [vmem:[%s232_s22 + $0x18] sm:$0xff]  ;;  %v301_v11 = vmul.f32 0.125, %v289_v6  ;;  %v295_v25 = vld [vmem:[%s250_s18] sm:$0xff] }
  0x7b   : > { %1148 = vmatpush3.xpose.msk.msra.mxu0 %vm303_vm1, %v291_v1  ;;  %1153 = vmatpush3.xpose.msk.msra.mxu1 %vm303_vm1, %v292_v3  ;;  %v294_v10 = vld [vmem:[%s241_s9 + $0x18] sm:$0xff]  ;;  %v302_v12 = vmul.f32 0.125, %v290_v9  ;;  %v296_v26 = vld [vmem:[%s250_s18 + $0x8] sm:$0xff]  ;;  %v297_v39 = vld [vmem:[%s250_s18 + $0x10] sm:$0xff]  ;;  %s964_s16 = sshll.u32 %s282_s24, 4  ;;  %s1130_s20 = sshll.u32 %s1449_s15, 9  ;;  %s1764_s16 = int_to_ptr.vmem [resolvable:$true] %s964_s16 }
  0x7c   : > { %1157 = vmatprep.subr.mxu0 %v1464_v0  ;;  %1162 = vmatprep.subr.mxu1 %v1464_v0  ;;  %v298_v42 = vld [vmem:[%s250_s18 + $0x18] sm:$0xff]  ;;  %s1771_s30 = scalar_lea.hbm %s1824_s3, %s1130_s20  ;;  %s950_s15 = scalar_lea.sflag [#allocation4], %s1699_s21 }
  0x7d   : > { %s1371_s6 = scalar_lea.vmem %s1764_s16, 512  ;;  %p1853_p10 = scmp.ne.s32.totalorder %s1839_s25, 0 }
  0x7e   : > { %1150 = vmatmul.mubr.msk.f32.vlgmr.msra.gmra.mrb[0].mxu0 %vm303_vm1, %v299_v4  ;;  %1155 = vmatmul.mubr.msk.f32.vlgmr.msra.gmra.mrb[0].mxu1 %vm303_vm1, %v300_v8  ;;  %p1372_p0 = scmp.ne.s32.totalorder %s1764_s16, %s1371_s6  ;;  %s1466_s8 = smov [#allocation8]  }
  0x7f   : > { %1158 = vmatpush3.xpose.msk.msra.mxu0 %vm303_vm1, %v293_v7  ;;  %1159 = vmatprep.mubr.msk.f32.mxu0 %vm1465_vm0, %v1464_v0  ;;  %s1375_s26 = sshll.u32 %s1466_s8, 4  ;;  %s1376_s26 = int_to_ptr.vmem [resolvable:$false] %s1375_s26 }
  0x80   : > { %1163 = vmatpush3.xpose.msk.msra.mxu1 %vm303_vm1, %v294_v10  ;;  %1164 = vmatprep.mubr.msk.f32.mxu1 %vm1465_vm0, %v1464_v0  ;;  %p1373_p8 = pnand %p1372_p0, %p1853_p10  ;;  %s1377_s1 = scalar_lea.vmem %s1376_s26, 1024 }
  0x81   : > { %1167 = vmatprep.subr.mxu0 %v1464_v0  ;;  %1172 = vmatprep.subr.mxu1 %v1464_v0  ;;  %p1378_p12 = scmp.lt.s32.totalorder %s1764_s16, %s1376_s26  ;;  %p1379_p1 = scmp.lt.s32.totalorder %s1377_s1, %s1371_s6 }
  0x82   : > { %1160 = vmatmul.mubr.msk.f32.vlgmr.msra.gmra.mrb[2].mxu0 %vm303_vm1, %v301_v11  ;;  %p1374_p9 = pneg %p1373_p8 }
  0x83   : > { %1165 = vmatmul.mubr.msk.f32.vlgmr.msra.gmra.mrb[2].mxu1 %vm303_vm1, %v302_v12  ;;  %1169 = vmatprep.mubr.msk.f32.mxu0 %vm1465_vm0, %v1464_v0  ;;  %p1380_p6 = por %p1379_p1, %p1378_p12 }
  0x84   : > { %1174 = vmatprep.mubr.msk.f32.mxu1 %vm1465_vm0, %v1464_v0  ;;  %1168 = vmatpush3.msra.mxu0 %v295_v25 }
  0x85   : > { %1177 = vmatprep.subr.mxu0 %v1464_v0  ;;  %1173 = vmatpush3.msra.mxu1 %v296_v26  ;;  %p1381_p13 = pnand %p1380_p6, %p1374_p9 }
  0x86   : > { %1182 = vmatprep.subr.mxu1 %v1464_v0 }
 0x151   : > { %v376_v13 = vpop.f32.mrb[0].mxu0  ;;  %v452_v14 = vpop.f32.mrb[0].mxu1 }
 0x152   : > { %v1151_v15 = vpop.f32.mrb[1].mxu0  ;;  %v609_v16 = vsel %vm608_vm2, %v376_v13, -inf  ;;  %v1156_v17 = vpop.f32.mrb[1].mxu1  ;;  %v612_v18 = vsel %vm608_vm2, %v452_v14, -inf }
 0x153   : > { %610 = vmax.xlane.f32.xlu0 %v609_v16 }
 0x155   : > { %v528_v19 = vpop.f32.mrb[2].mxu0 }
 0x156   : > { %v1161_v20 = vpop.f32.mrb[3].mxu0  ;;  %v615_v21 = vsel %vm608_vm2, %v528_v19, -inf  ;;  %v604_v22 = vpop.f32.mrb[2].mxu1 }
 0x157   : > { %613 = vmax.xlane.f32.xlu0 %v612_v18  ;;  %616 = vmax.xlane.f32.xlu1 %v615_v21  ;;  %v1166_v23 = vpop.f32.mrb[3].mxu1  ;;  %v618_v24 = vsel %vm608_vm2, %v604_v22, -inf }
 0x15b   : > { %619 = vmax.xlane.f32.xlu1 %v618_v24 }
 0x1e0   : > { %v611_v27 = vpop.xlane.xlu0 %610 }
 0x1e1   : > { %v621_v28 = vsub.f32 %v376_v13, %v611_v27 }
 0x1e3   : > { %v625_v29 = vmul.f32 1.442695, %v621_v28 }
 0x1e4   : > { %v614_v30 = vpop.xlane.xlu0 %613  ;;  %v617_v31 = vpop.xlane.xlu1 %616 }
 0x1e5   : > { %1265 = vpow2.f32 %v625_v29  ;;  %v622_v32 = vsub.f32 %v452_v14, %v614_v30  ;;  %v623_v33 = vsub.f32 %v528_v19, %v617_v31 }
 0x1e7   : > { %v627_v34 = vmul.f32 1.442695, %v622_v32  ;;  %v629_v35 = vmul.f32 1.442695, %v623_v33 }
 0x1e8   : > { %v620_v36 = vpop.xlane.xlu1 %619 }
 0x1e9   : > { %1267 = vpow2.f32 %v627_v34  ;;  %v624_v37 = vsub.f32 %v604_v22, %v620_v36 }
 0x1ea   : > { %1269 = vpow2.f32 %v629_v35 }
 0x1eb   : > { %v631_v38 = vmul.f32 1.442695, %v624_v37 }
 0x1ed   : > { %1271 = vpow2.f32 %v631_v38 }
 0x1ef   : > { %v1266_v40 = vpop.eup %1265 }
 0x1f0   : > { %1170 = vmatmul.mubr.msk.f32.vlgmr.msra.gmra.mrb[4].mxu0 %vm608_vm2, %v1266_v40  ;;  %v633_v41 = vsel %vm608_vm2, %v1266_v40, 0.0 }
 0x1f1   : > { %634 = vadd.xlane.f32.xlu0 %v633_v41  ;;  %1178 = vmatpush3.msra.mxu0 %v297_v39 }
 0x1f2   : > { %1179 = vmatprep.mubr.msk.f32.mxu0 %vm1465_vm0, %v1464_v0 }
 0x1f3   : > { %v1268_v43 = vpop.eup %1267 }
 0x1f4   : > { %v1270_v44 = vpop.eup %1269  ;;  %1175 = vmatmul.mubr.msk.f32.vlgmr.msra.gmra.mrb[4].mxu1 %vm608_vm2, %v1268_v43  ;;  %v636_v45 = vsel %vm608_vm2, %v1268_v43, 0.0 }
 0x1f5   : > { %1180 = vmatmul.mubr.msk.f32.vlgmr.msra.gmra.mrb[6].mxu0 %vm608_vm2, %v1270_v44  ;;  %1183 = vmatpush3.msra.mxu1 %v298_v42  ;;  %v639_v46 = vsel %vm608_vm2, %v1270_v44, 0.0 }
 0x1f6   : > { %637 = vadd.xlane.f32.xlu1 %v636_v45  ;;  %640 = vadd.xlane.f32.xlu0 %v639_v46 }
 0x1f7   : > { %v1272_v47 = vpop.eup %1271  ;;  %1184 = vmatprep.mubr.msk.f32.mxu1 %vm1465_vm0, %v1464_v0 }
 0x1f8   : > { %1185 = vmatmul.mubr.msk.f32.vlgmr.msra.gmra.mrb[6].mxu1 %vm608_vm2, %v1272_v47  ;;  %v642_v48 = vsel %vm608_vm2, %v1272_v47, 0.0 }
 0x1fa   : > { %643 = vadd.xlane.f32.xlu1 %v642_v48 }
 0x27e   : > { %v635_v49 = vpop.xlane.xlu0 %634 }
 0x27f   : > { %1273 = vrcp.f32 %v635_v49 }
 0x283   : > { %v638_v50 = vpop.xlane.xlu1 %637  ;;  %v641_v51 = vpop.xlane.xlu0 %640 }
 0x284   : > { %1275 = vrcp.f32 %v638_v50 }
 0x285   : > { %1277 = vrcp.f32 %v641_v51 }
 0x287   : > { %v644_v52 = vpop.xlane.xlu1 %643 }
 0x288   : > { %1279 = vrcp.f32 %v644_v52 }
 0x289   : > { %v1274_v53 = vpop.eup %1273 }
 0x28e   : > { %v1276_v57 = vpop.eup %1275 }
 0x28f   : > { %v1278_v59 = vpop.eup %1277 }
 0x292   : > { %v1280_v1 = vpop.eup %1279 }
 0x2c3   : > { %v714_v54 = vpop.f32.mrb[4].mxu0 }
 0x2c4   : > { %v941_v55 = vmul.f32 %v1274_v53, %v714_v54  ;;  %v1171_v56 = vpop.f32.mrb[5].mxu0 }
 0x2c6   : > { %945 = vst.msk [vmem:[%s282_s24] sm:$0xff] %vm303_vm1, %v941_v55 }
 0x2c7   : > { %v787_v58 = vpop.f32.mrb[4].mxu1 }
 0x2c8   : > { %v942_v60 = vmul.f32 %v1276_v57, %v787_v58  ;;  %v860_v61 = vpop.f32.mrb[6].mxu0  ;;  %v1176_v62 = vpop.f32.mrb[5].mxu1 }
 0x2c9   : > { %v943_v63 = vmul.f32 %v1278_v59, %v860_v61  ;;  %v1181_v0 = vpop.f32.mrb[7].mxu0 }
 0x2ca   : > { %946 = vst.msk [vmem:[%s282_s24 + $0x8] sm:$0xff] %vm303_vm1, %v942_v60 }
 0x2cb   : > { %947 = vst.msk [vmem:[%s282_s24 + $0x10] sm:$0xff] %vm303_vm1, %v943_v63  ;;  %v933_v2 = vpop.f32.mrb[6].mxu1 }
 0x2cc   : > { %v944_v3 = vmul.f32 %v1280_v1, %v933_v2  ;;  %v1186_v4 = vpop.f32.mrb[7].mxu1 }
 0x2ce   : > { %948 = vst.msk [vmem:[%s282_s24 + $0x18] sm:$0xff] %vm303_vm1, %v944_v3 }
 0x2cf   : > { %1384 = shalt.err (!%p1381_p13)
}
 0x2d0   : > { %s1385_s28 = scalar_lea.hbm %s1771_s30, 512  ;;  %s1389_s10 = scalar_lea.hbm %s1824_s3, 1024 }
 0x2d1   : > { %p1386_p11 = scmp.ne.s32.totalorder %s1771_s30, %s1385_s28  ;;  %p1390_p7 = scmp.lt.u32.totalorder %s1771_s30, %s1824_s3 }
 0x2d2   : > { %p1391_p4 = scmp.lt.u32.totalorder %s1389_s10, %s1385_s28  ;;  %p1393_p0 = scmp.lt.u32.totalorder %s1385_s28, %s1771_s30 }
 0x2d3   : > { %p1387_p2 = pnand %p1386_p11, %p1853_p10 }
 0x2d4   : > { %p1392_p3 = por %p1391_p4, %p1390_p7 }
 0x2d5   : > { %p1388_p5 = pneg %p1387_p2 }
 0x2d6   : > { %p1394_p8 = por %p1393_p0, %p1392_p3 }
 0x2d8   : > { %p1395_p9 = pnand %p1394_p8, %p1388_p5 }
 0x2da   : > { %1398 = shalt.err (!%p1395_p9)
}
 0x2db   : > { %s1467_s11 = smov 128   ;;  %s1468_s19 = smov 8  }
 0x2dc   : > { %1193 = dma.vmem_to_hbm [thread:$0]  (%p1853_p10), %s1764_s16, 512, %s1771_s30, %s950_s15, %s1467_s11, %s1467_s11, %s1468_s19  }
 0x2dd PF: > { %s979_s9 = sand.u32 1, %s1437_s12   ;;  %p1854_p12 = scmp.ne.s32.totalorder %s1841_s27, 0 }
 0x2de   : > { %p1855_p1 = scmp.ge.s32.totalorder %s1457_s17, 2  ;;  %s980_s18 = scalar_lea.sflag [#allocation4], %s979_s9 }
 0x2e0   : > { %p1206_p6 = pnand %p1855_p1, %p1854_p12 }
 0x2e2   : > { %1432 = dma.done.wait (!%p1206_p6), %s980_s18, 512  }
 0x2e3   : > { %1434 = vsyncadd (!%p1206_p6), %s980_s18, 4294966784  ;;  %s22_s17 = sadd.s32 1, %s1457_s17   ;;  %s1856_s24 = sld [smem:[#allocation14_spill]] }
 0x2e4   : > { %p19_p13 = scmp.ge.s32.totalorder %s22_s17, 4   ;;  %s1857_s15 = sld [smem:[#allocation12_spill]] }
 0x2e5   : > { %s1858_s16 = sld [smem:[#allocation13_spill]]  ;;  %s1859_s12 = smov %s1441_s13 }
 0x2e6   : > { %s1860_s13 = smov %s1445_s14  ;;  %21 = sbr.rel (!%p19_p13) target bundleno = 10 (0xa), region = 101 }
 0x2e9   : > { %s1861_s14 = smov %s1856_s24 }
 0x2ed   :  { %985 = vsyncpa [#allocation3], 1 }
 0x2ee   :  { %987 = vsyncpa [#allocation3 + $0x1], 1 }
 0x2ef   :  { %988 = vsyncpa [#allocation6], 1 }
 0x2f0   :  { %990 = vsyncpa [#allocation6 + $0x1], 1 }
 0x2f1   :  { %991 = vsyncpa [#allocation4], 1 }
 0x2f2   :  { %993 = vsyncpa [#allocation4 + $0x1], 1 }

</bundles_post_ra>
